<compile_context>
chip_gen: v7x
topology: tpu7x:2x2x1
jax: 0.10.0
libtpu: 0.0.40
codegen_flags: <defaults>
</compile_context>

<pallas_src>
import functools

import jax
import jax.numpy as jnp
from jax.experimental import pallas as pl
from jax.experimental.pallas import tpu as pltpu

TM = 128   # row tile (MXU-friendly, lane-dense stores)
# TODO(synk): on 128-MiB-VMEM chips (v5e/v6e) TM could be raised to 256 to
# further amortize per-step overhead; 128 is kept as the portable default.


def _round_up(v, m):
    return (v + m - 1) // m * m


def _pick_col_tile(n_pad):
    for t in (512, 256, 128):
        if n_pad % t == 0:
            return t
    return 128


def _vmem_limit_bytes():
    """Generation-aware scoped-VMEM budget (~75% of capacity, capped)."""
    try:
        cap = pltpu.get_tpu_info().vmem_capacity_bytes
    except Exception:
        cap = 64 * 1024 * 1024
    return max(32 * 1024 * 1024, min(int(cap) * 3 // 4, 100 * 1024 * 1024))


# ----------------------------------------------------------------------------
# Kernel 1 (high-dim, pass 1): streaming row statistics of the Gaussian kernel.
#   logits_ij = -||x_i - x_j||^2 / (2 sigma^2),  masked (diag, padding)
#   outputs: m_i = max_j logits_ij,  l_i = sum_j exp(logits_ij - m_i)
# Column-tiled online max/sum: VMEM O(TM*TN), independent of N.
# ----------------------------------------------------------------------------
def _gaussian_stats_kernel(x_row_ref, xt_ref, sqc_ref, sqr_ref, m_ref, l_ref, *,
                           n, inv_two_sigma2):
    i = pl.program_id(0)
    j = pl.program_id(1)

    @pl.when(j == 0)
    def _init():
        m_ref[...] = jnp.full(m_ref.shape, -1e30, jnp.float32)
        l_ref[...] = jnp.zeros(l_ref.shape, jnp.float32)

    cross = jnp.dot(x_row_ref[...], xt_ref[...],
                    preferred_element_type=jnp.float32)           # [TM, TN]
    d2 = jnp.maximum(sqc_ref[...] + sqr_ref[...] - 2.0 * cross, 0.0)
    logits = d2 * jnp.float32(-inv_two_sigma2)

    tm, tn = logits.shape
    row_ids = i * tm + jax.lax.broadcasted_iota(jnp.int32, logits.shape, 0)
    col_ids = j * tn + jax.lax.broadcasted_iota(jnp.int32, logits.shape, 1)
    mask = (row_ids != col_ids) & (row_ids < n) & (col_ids < n)

    s = jnp.where(mask, logits, jnp.float32(-1e30))
    m_new = jnp.maximum(m_ref[...], jnp.max(s, axis=-1, keepdims=True))
    p = jnp.where(mask, jnp.exp(s - m_new), 0.0)
    alpha = jnp.exp(m_ref[...] - m_new)
    l_ref[...] = alpha * l_ref[...] + jnp.sum(p, axis=-1, keepdims=True)
    m_ref[...] = m_new


# ----------------------------------------------------------------------------
# Kernel 2 (high-dim, pass 2): recompute logits per block and write the
# symmetrized probability directly (fused normalize + symmetrize, one write):
#   P_ij = ( exp(L_ij - m_i)/l_i + exp(L_ij - m_j)/l_j ) / (2 n),  P_ii = 0
# Output shape is (n, n); out-of-range boundary writes are discarded.
# ----------------------------------------------------------------------------
def _gaussian_sym_kernel(x_row_ref, xt_ref, sqc_ref, sqr_ref,
                         mi_ref, ili_ref, mj_ref, ilj_ref, o_ref, *,
                         inv_two_sigma2, inv_two_n):
    i = pl.program_id(0)
    j = pl.program_id(1)

    cross = jnp.dot(x_row_ref[...], xt_ref[...],
                    preferred_element_type=jnp.float32)           # [TM, TN]
    d2 = jnp.maximum(sqc_ref[...] + sqr_ref[...] - 2.0 * cross, 0.0)
    logits = d2 * jnp.float32(-inv_two_sigma2)

    p_i = jnp.exp(logits - mi_ref[...]) * ili_ref[...]            # p_{j|i}
    p_j = jnp.exp(logits - mj_ref[...]) * ilj_ref[...]            # p_{i|j}

    tm, tn = logits.shape
    row_ids = i * tm + jax.lax.broadcasted_iota(jnp.int32, logits.shape, 0)
    col_ids = j * tn + jax.lax.broadcasted_iota(jnp.int32, logits.shape, 1)
    not_diag = row_ids != col_ids

    o_ref[...] = jnp.where(not_diag, (p_i + p_j) * jnp.float32(inv_two_n), 0.0)


# ----------------------------------------------------------------------------
# Kernel 3 (low-dim, pass 1): Student-t per-row-tile partial sums only
# (no q writeback).  q_ij = 1/(1 + ||z_i - z_j||^2), q_ii = 0.
# ----------------------------------------------------------------------------
def _student_sum_kernel(z_row_ref, zt_ref, s_ref, *, n, d_low):
    i = pl.program_id(0)
    j = pl.program_id(1)

    @pl.when(j == 0)
    def _init():
        s_ref[...] = jnp.zeros(s_ref.shape, jnp.float32)

    z_row = z_row_ref[...]                        # [TM, d_low]
    zt = zt_ref[...]                              # [d_low, TN]
    diff = z_row[:, 0:1] - zt[0:1, :]
    d2 = diff * diff
    for k in range(1, d_low):                     # static unroll (d_low tiny)
        diff = z_row[:, k:k + 1] - zt[k:k + 1, :]
        d2 = d2 + diff * diff
    # TODO(synk): for large d_low switch to the MXU ||a||^2+||b||^2-2ab path.

    tm, tn = d2.shape
    row_ids = i * tm + jax.lax.broadcasted_iota(jnp.int32, d2.shape, 0)
    col_ids = j * tn + jax.lax.broadcasted_iota(jnp.int32, d2.shape, 1)
    mask = (row_ids != col_ids) & (row_ids < n) & (col_ids < n)

    q = jnp.where(mask, pl.reciprocal(1.0 + d2, approx=True), 0.0)
    s_ref[...] += jnp.sum(q, axis=-1, keepdims=True)


# ----------------------------------------------------------------------------
# Kernel 4 (low-dim, pass 2): recompute q and write q * (1/sum) directly.
# ----------------------------------------------------------------------------
def _student_write_kernel(inv_ref, z_row_ref, zt_ref, o_ref, *, d_low):
    i = pl.program_id(0)
    j = pl.program_id(1)

    z_row = z_row_ref[...]
    zt = zt_ref[...]
    diff = z_row[:, 0:1] - zt[0:1, :]
    d2 = diff * diff
    for k in range(1, d_low):
        diff = z_row[:, k:k + 1] - zt[k:k + 1, :]
        d2 = d2 + diff * diff

    tm, tn = d2.shape
    row_ids = i * tm + jax.lax.broadcasted_iota(jnp.int32, d2.shape, 0)
    col_ids = j * tn + jax.lax.broadcasted_iota(jnp.int32, d2.shape, 1)
    not_diag = row_ids != col_ids

    q = jnp.where(not_diag, pl.reciprocal(1.0 + d2, approx=True), 0.0)
    o_ref[...] = q * inv_ref[0, 0]


# ----------------------------------------------------------------------------
# Kernel 5: standalone tiled symmetrize  ->  (P[i,j] + P[j,i]^T) / (2 n)
# (interface method; the high-dim forward path uses the fused kernel above)
# ----------------------------------------------------------------------------
def _symmetrize_kernel(p_ref, pt_ref, o_ref, *, inv_two_n):
    o_ref[...] = (p_ref[...] + pt_ref[...].T) * jnp.float32(inv_two_n)


class SimilarityCalculator:
    """JAX/Pallas re-implementation of the (abstract) similarity calculator."""

    def __init__(self, sigma2=1.0):
        # TODO(synk): fixed global sigma^2; per-point perplexity calibration
        # (binary search over bandwidths) is out of scope for this interface.
        self._sigma2 = float(sigma2)
        self._high_dim_similarity = None
        self.disable_tqdm = False

    @property
    def high_dim_similarity(self):
        return self._high_dim_similarity

    # -- standalone symmetrize (interface): 2-D tiled, bandwidth bound --------
    def symmetrize(self, prob, n):
        n0 = prob.shape[0]
        ts = 512 if n0 >= 512 else (256 if n0 >= 256 else 128)
        grid = (pl.cdiv(n0, ts), pl.cdiv(n0, ts))
        return pl.pallas_call(
            functools.partial(_symmetrize_kernel, inv_two_n=1.0 / (2.0 * n)),
            out_shape=jax.ShapeDtypeStruct((n0, n0), jnp.float32),
            grid=grid,
            in_specs=[
                pl.BlockSpec((ts, ts), lambda i, j: (i, j)),
                pl.BlockSpec((ts, ts), lambda i, j: (j, i)),
            ],
            out_specs=pl.BlockSpec((ts, ts), lambda i, j: (i, j)),
            compiler_params=pltpu.CompilerParams(
                dimension_semantics=("parallel", "parallel"),
                vmem_limit_bytes=_vmem_limit_bytes()),
        )(prob, prob)

    # -- high-dim Gaussian conditional similarities (symmetrized) -------------
    def calculate_high_dim_similarity(self, x):
        n, d = x.shape
        n_pad = _round_up(max(n, TM), TM)
        tn = _pick_col_tile(n_pad)
        vmem = _vmem_limit_bytes()
        inv2s2 = 1.0 / (2.0 * self._sigma2)

        # One-time hoisted precomputation (O(N*d) glue, not the hot path).
        x32 = jnp.pad(x.astype(jnp.float32), ((0, n_pad - n), (0, 0)))
        sq = jnp.sum(x32 * x32, axis=-1)
        x_bf = x32.astype(jnp.bfloat16)
        xt_bf = x_bf.T                               # [d, n_pad]
        sq_col = sq[:, None]                         # [n_pad, 1]
        sq_row = sq[None, :]                         # [1, n_pad]

        # Pass 1: flash-style row statistics (max + sum of shifted exp).
        m_col, l_col = pl.pallas_call(
            functools.partial(_gaussian_stats_kernel, n=n,
                              inv_two_sigma2=inv2s2),
            out_shape=(jax.ShapeDtypeStruct((n_pad, 1), jnp.float32),
                       jax.ShapeDtypeStruct((n_pad, 1), jnp.float32)),
            grid=(n_pad // TM, n_pad // tn),
            in_specs=[
                pl.BlockSpec((TM, d), lambda i, j: (i, 0)),      # x rows (bf16)
                pl.BlockSpec((d, tn), lambda i, j: (0, j)),      # x^T cols
                pl.BlockSpec((TM, 1), lambda i, j: (i, 0)),      # ||x_i||^2
                pl.BlockSpec((1, tn), lambda i, j: (0, j)),      # ||x_j||^2
            ],
            out_specs=(pl.BlockSpec((TM, 1), lambda i, j: (i, 0)),
                       pl.BlockSpec((TM, 1), lambda i, j: (i, 0))),
            compiler_params=pltpu.CompilerParams(
                dimension_semantics=("parallel", "arbitrary"),
                vmem_limit_bytes=vmem),
        )(x_bf, xt_bf, sq_col, sq_row)

        # O(N) glue: exact reciprocals + row-layout copies of the statistics.
        inv_l_col = 1.0 / (l_col + 1e-12)            # [n_pad, 1]
        m_row = m_col.reshape(1, n_pad)              # [1, n_pad]
        inv_l_row = inv_l_col.reshape(1, n_pad)      # [1, n_pad]

        # Pass 2: fused normalize + symmetrize, single N^2 write at (n, n).
        sym = pl.pallas_call(
            functools.partial(_gaussian_sym_kernel,
                              inv_two_sigma2=inv2s2,
                              inv_two_n=1.0 / (2.0 * n)),
            out_shape=jax.ShapeDtypeStruct((n, n), jnp.float32),
            grid=(pl.cdiv(n, TM), pl.cdiv(n, tn)),
            in_specs=[
                pl.BlockSpec((TM, d), lambda i, j: (i, 0)),
                pl.BlockSpec((d, tn), lambda i, j: (0, j)),
                pl.BlockSpec((TM, 1), lambda i, j: (i, 0)),
                pl.BlockSpec((1, tn), lambda i, j: (0, j)),
                pl.BlockSpec((TM, 1), lambda i, j: (i, 0)),      # m_i
                pl.BlockSpec((TM, 1), lambda i, j: (i, 0)),      # 1/l_i
                pl.BlockSpec((1, tn), lambda i, j: (0, j)),      # m_j
                pl.BlockSpec((1, tn), lambda i, j: (0, j)),      # 1/l_j
            ],
            out_specs=pl.BlockSpec((TM, tn), lambda i, j: (i, j)),
            compiler_params=pltpu.CompilerParams(
                dimension_semantics=("parallel", "parallel"),
                vmem_limit_bytes=vmem),
        )(x_bf, xt_bf, sq_col, sq_row, m_col, inv_l_col, m_row, inv_l_row)

        self._high_dim_similarity = sym
        return sym

    # -- low-dim Student-t similarities ---------------------------------------
    def calculate_low_dim_similarity(self, z):
        n, d_low = z.shape
        n_pad = _round_up(max(n, TM), TM)
        tn = _pick_col_tile(n_pad)
        vmem = _vmem_limit_bytes()

        z_pad = jnp.pad(z.astype(jnp.float32), ((0, n_pad - n), (0, 0)))
        zt = z_pad.T                                  # [d_low, n_pad], hoisted

        # Pass 1: per-row-tile partial sums only (no N^2 writeback).
        row_sums = pl.pallas_call(
            functools.partial(_student_sum_kernel, n=n, d_low=d_low),
            out_shape=jax.ShapeDtypeStruct((n_pad, 1), jnp.float32),
            grid=(n_pad // TM, n_pad // tn),
            in_specs=[
                pl.BlockSpec((TM, d_low), lambda i, j: (i, 0)),
                pl.BlockSpec((d_low, tn), lambda i, j: (0, j)),
            ],
            out_specs=pl.BlockSpec((TM, 1), lambda i, j: (i, 0)),
            compiler_params=pltpu.CompilerParams(
                dimension_semantics=("parallel", "arbitrary"),
                vmem_limit_bytes=vmem),
        )(z_pad, zt)

        inv = (1.0 / (jnp.sum(row_sums) + 1e-12)).reshape(1, 1)
        inv = inv.astype(jnp.float32)

        # Pass 2: recompute q, scale, write directly at (n, n) (one N^2 write).
        q = pl.pallas_call(
            functools.partial(_student_write_kernel, d_low=d_low),
            out_shape=jax.ShapeDtypeStruct((n, n), jnp.float32),
            grid=(pl.cdiv(n, TM), pl.cdiv(n, tn)),
            in_specs=[
                pl.BlockSpec(memory_space=pltpu.MemorySpace.SMEM),   # 1/sum
                pl.BlockSpec((TM, d_low), lambda i, j: (i, 0)),
                pl.BlockSpec((d_low, tn), lambda i, j: (0, j)),
            ],
            out_specs=pl.BlockSpec((TM, tn), lambda i, j: (i, j)),
            compiler_params=pltpu.CompilerParams(
                dimension_semantics=("parallel", "parallel"),
                vmem_limit_bytes=vmem),
        )(inv, z_pad, zt)

        return q

    def forward(self, x, z):
        high = self.calculate_high_dim_similarity(x)
        low = self.calculate_low_dim_similarity(z)
        return low, high

    __call__ = forward


if __name__ == "__main__":
    N, D_HIGH, D_LOW = 64, 32, 2

    key = jax.random.PRNGKey(0)
    kx, kz = jax.random.split(key)
    x = jax.random.normal(kx, (N, D_HIGH), dtype=jnp.float32)        # high-dim data
    z = 0.01 * jax.random.normal(kz, (N, D_LOW), dtype=jnp.float32)  # low-dim embedding

    calc = SimilarityCalculator(sigma2=1.0)
    low_sim, high_sim = calc(x, z)
    jax.block_until_ready((low_sim, high_sim))

    assert low_sim.shape == (N, N) and high_sim.shape == (N, N)
    assert bool(jnp.all(jnp.isfinite(low_sim))) and bool(jnp.all(jnp.isfinite(high_sim)))
    # symmetry + probability-mass sanity checks
    assert bool(jnp.allclose(high_sim, high_sim.T, atol=1e-5))
    assert abs(float(jnp.sum(high_sim)) - 1.0) < 1e-3
    assert abs(float(jnp.sum(low_sim)) - 1.0) < 1e-3
    # standalone symmetrize path (interface method) stays consistent
    eye_free = jnp.ones((N, N), jnp.float32) - jnp.eye(N, dtype=jnp.float32)
    sym_check = calc.symmetrize(eye_free / (N - 1), N)
    jax.block_until_ready(sym_check)
    assert abs(float(jnp.sum(sym_check)) - 1.0) < 1e-3

    print("KERNEL_OK")
</pallas_src>

<mosaic_0001>
module attributes {stable_mosaic.version = 11 : i64} {
  func.func @_gaussian_stats_kernel(%arg0: i32, %arg1: i32, %arg2: memref<128x32xbf16, #tpu.memory_space<vmem>>, %arg3: memref<32x128xbf16, #tpu.memory_space<vmem>>, %arg4: memref<128x1xf32, #tpu.memory_space<vmem>>, %arg5: memref<1x128xf32, #tpu.memory_space<vmem>>, %arg6: memref<128x1xf32, #tpu.memory_space<vmem>>, %arg7: memref<128x1xf32, #tpu.memory_space<vmem>>) attributes {dimension_semantics = [#tpu.dimension_semantics<parallel>, #tpu.dimension_semantics<arbitrary>], iteration_bounds = array<i64: 1, 1>, scalar_prefetch = 0 : i64, scratch_operands = 0 : i64, tpu.core_type = #tpu.core_type<tc>, window_params = [{transform_indices = @transform_0, window_bounds = array<i64: 128, 32>}, {transform_indices = @transform_1, window_bounds = array<i64: 32, 128>}, {transform_indices = @transform_2, window_bounds = array<i64: 128, 1>}, {transform_indices = @transform_3, window_bounds = array<i64: 1, 128>}, {transform_indices = @transform_4, window_bounds = array<i64: 128, 1>}, {transform_indices = @transform_5, window_bounds = array<i64: 128, 1>}]} {
    %c0_i32 = arith.constant 0 : i32
    %0 = arith.cmpi eq, %arg1, %c0_i32 : i32
    %1 = arith.extui %0 : i1 to i32
    %c0_i32_0 = arith.constant 0 : i32
    %2 = arith.cmpi ne, %1, %c0_i32_0 : i32
    scf.if %2 {
      %cst_27 = arith.constant -1.000000e+30 : f32
      %54 = vector.broadcast %cst_27 : f32 to vector<128x1xf32>
      %c0_28 = arith.constant 0 : index
      %c0_29 = arith.constant 0 : index
      %55 = vector.load %arg6[%c0_28, %c0_29] : memref<128x1xf32, #tpu.memory_space<vmem>>, vector<128x1xf32>
      tpu.vector_store %arg6[%c0_28, %c0_29], %54 {strides = array<i32>} : memref<128x1xf32, #tpu.memory_space<vmem>>, vector<128x1xf32>,
      %cst_30 = arith.constant 0.000000e+00 : f32
      %56 = vector.broadcast %cst_30 : f32 to vector<128x1xf32>
      %c0_31 = arith.constant 0 : index
      %c0_32 = arith.constant 0 : index
      %57 = vector.load %arg7[%c0_31, %c0_32] : memref<128x1xf32, #tpu.memory_space<vmem>>, vector<128x1xf32>
      tpu.vector_store %arg7[%c0_31, %c0_32], %56 {strides = array<i32>} : memref<128x1xf32, #tpu.memory_space<vmem>>, vector<128x1xf32>,
    } else {
    }
    %c0 = arith.constant 0 : index
    %c0_1 = arith.constant 0 : index
    %3 = vector.load %arg2[%c0, %c0_1] : memref<128x32xbf16, #tpu.memory_space<vmem>>, vector<128x32xbf16>
    %c0_2 = arith.constant 0 : index
    %c0_3 = arith.constant 0 : index
    %4 = vector.load %arg3[%c0_2, %c0_3] : memref<32x128xbf16, #tpu.memory_space<vmem>>, vector<32x128xbf16>
    %cst = arith.constant dense<0.000000e+00> : vector<128x128xf32>
    %5 = tpu.matmul %3, %4, %cst {dimension_numbers = #tpu.dot_dimension_numbers<[1], [0], [0], [1], [0, 0, 1, 1], [], []>} : vector<128x32xbf16>, vector<32x128xbf16>, vector<128x128xf32> -> vector<128x128xf32>
    %c0_4 = arith.constant 0 : index
    %c0_5 = arith.constant 0 : index
    %6 = vector.load %arg4[%c0_4, %c0_5] : memref<128x1xf32, #tpu.memory_space<vmem>>, vector<128x1xf32>
    %c0_6 = arith.constant 0 : index
    %c0_7 = arith.constant 0 : index
    %7 = vector.load %arg5[%c0_6, %c0_7] : memref<1x128xf32, #tpu.memory_space<vmem>>, vector<1x128xf32>
    %8 = vector.broadcast %6 : vector<128x1xf32> to vector<128x128xf32>
    %9 = vector.broadcast %7 : vector<1x128xf32> to vector<128x128xf32>
    %10 = arith.addf %8, %9 : vector<128x128xf32>
    %cst_8 = arith.constant 2.000000e+00 : f32
    %11 = vector.broadcast %cst_8 : f32 to vector<128x128xf32>
    %12 = arith.mulf %11, %5 : vector<128x128xf32>
    %13 = arith.subf %10, %12 : vector<128x128xf32>
    %cst_9 = arith.constant 0.000000e+00 : f32
    %14 = vector.broadcast %cst_9 : f32 to vector<128x128xf32>
    %15 = arith.maximumf %13, %14 : vector<128x128xf32>
    %cst_10 = arith.constant -5.000000e-01 : f32
    %16 = vector.broadcast %cst_10 : f32 to vector<128x128xf32>
    %17 = arith.mulf %15, %16 : vector<128x128xf32>
    %c128_i32 = arith.constant 128 : i32
    %18 = arith.muli %arg0, %c128_i32 : i32
    %19 = tpu.iota {dimensions = array<i32: 0>} : vector<128x128xi32>
    %20 = vector.broadcast %18 : i32 to vector<128x128xi32>
    %21 = arith.addi %20, %19 : vector<128x128xi32>
    %c128_i32_11 = arith.constant 128 : i32
    %22 = arith.muli %arg1, %c128_i32_11 : i32
    %23 = tpu.iota {dimensions = array<i32: 1>} : vector<128x128xi32>
    %24 = vector.broadcast %22 : i32 to vector<128x128xi32>
    %25 = arith.addi %24, %23 : vector<128x128xi32>
    %26 = arith.cmpi ne, %21, %25 : vector<128x128xi32>
    %c64_i32 = arith.constant 64 : i32
    %27 = vector.broadcast %c64_i32 : i32 to vector<128x128xi32>
    %28 = arith.cmpi slt, %21, %27 : vector<128x128xi32>
    %29 = arith.andi %26, %28 : vector<128x128xi1>
    %c64_i32_12 = arith.constant 64 : i32
    %30 = vector.broadcast %c64_i32_12 : i32 to vector<128x128xi32>
    %31 = arith.cmpi slt, %25, %30 : vector<128x128xi32>
    %32 = arith.andi %29, %31 : vector<128x128xi1>
    %cst_13 = arith.constant -1.000000e+30 : f32
    %33 = vector.broadcast %cst_13 : f32 to vector<128x128xf32>
    %34 = arith.select %32, %17, %33 : vector<128x128xi1>, vector<128x128xf32>
    %c0_14 = arith.constant 0 : index
    %c0_15 = arith.constant 0 : index
    %35 = vector.load %arg6[%c0_14, %c0_15] : memref<128x1xf32, #tpu.memory_space<vmem>>, vector<128x1xf32>
    %cst_16 = arith.constant dense<0xFF800000> : vector<128xf32>
    %36 = vector.multi_reduction <maximumf>, %34, %cst_16 [1] : vector<128x128xf32> to vector<128xf32>
    %37 = vector.shape_cast %36 : vector<128xf32> to vector<128x1xf32>
    %38 = arith.maximumf %35, %37 : vector<128x1xf32>
    %39 = vector.broadcast %38 : vector<128x1xf32> to vector<128x128xf32>
    %40 = arith.subf %34, %39 : vector<128x128xf32>
    %41 = math.exp %40 : vector<128x128xf32>
    %cst_17 = arith.constant 0.000000e+00 : f32
    %42 = vector.broadcast %cst_17 : f32 to vector<128x128xf32>
    %43 = arith.select %32, %41, %42 : vector<128x128xi1>, vector<128x128xf32>
    %c0_18 = arith.constant 0 : index
    %c0_19 = arith.constant 0 : index
    %44 = vector.load %arg6[%c0_18, %c0_19] : memref<128x1xf32, #tpu.memory_space<vmem>>, vector<128x1xf32>
    %45 = arith.subf %44, %38 : vector<128x1xf32>
    %46 = math.exp %45 : vector<128x1xf32>
    %c0_20 = arith.constant 0 : index
    %c0_21 = arith.constant 0 : index
    %47 = vector.load %arg7[%c0_20, %c0_21] : memref<128x1xf32, #tpu.memory_space<vmem>>, vector<128x1xf32>
    %48 = arith.mulf %46, %47 : vector<128x1xf32>
    %cst_22 = arith.constant dense<0.000000e+00> : vector<128xf32>
    %49 = vector.multi_reduction <add>, %43, %cst_22 [1] : vector<128x128xf32> to vector<128xf32>
    %50 = vector.shape_cast %49 : vector<128xf32> to vector<128x1xf32>
    %51 = arith.addf %48, %50 : vector<128x1xf32>
    %c0_23 = arith.constant 0 : index
    %c0_24 = arith.constant 0 : index
    %52 = vector.load %arg7[%c0_23, %c0_24] : memref<128x1xf32, #tpu.memory_space<vmem>>, vector<128x1xf32>
    tpu.vector_store %arg7[%c0_23, %c0_24], %51 {strides = array<i32>} : memref<128x1xf32, #tpu.memory_space<vmem>>, vector<128x1xf32>,
    %c0_25 = arith.constant 0 : index
    %c0_26 = arith.constant 0 : index
    %53 = vector.load %arg6[%c0_25, %c0_26] : memref<128x1xf32, #tpu.memory_space<vmem>>, vector<128x1xf32>
    tpu.vector_store %arg6[%c0_25, %c0_26], %38 {strides = array<i32>} : memref<128x1xf32, #tpu.memory_space<vmem>>, vector<128x1xf32>,
    return
  }
  func.func @transform_0(%arg0: i32, %arg1: i32) -> (i32, i32) {
    %c0_i32 = arith.constant 0 : i32
    %c0_i32_0 = arith.constant 0 : i32
    return %arg0, %c0_i32 : i32, i32
  }
  func.func @transform_1(%arg0: i32, %arg1: i32) -> (i32, i32) {
    %c0_i32 = arith.constant 0 : i32
    %c0_i32_0 = arith.constant 0 : i32
    return %c0_i32, %arg1 : i32, i32
  }
  func.func @transform_2(%arg0: i32, %arg1: i32) -> (i32, i32) {
    %c0_i32 = arith.constant 0 : i32
    %c0_i32_0 = arith.constant 0 : i32
    return %arg0, %c0_i32 : i32, i32
  }
  func.func @transform_3(%arg0: i32, %arg1: i32) -> (i32, i32) {
    %c0_i32 = arith.constant 0 : i32
    %c0_i32_0 = arith.constant 0 : i32
    return %c0_i32, %arg1 : i32, i32
  }
  func.func @transform_4(%arg0: i32, %arg1: i32) -> (i32, i32) {
    %c0_i32 = arith.constant 0 : i32
    %c0_i32_0 = arith.constant 0 : i32
    return %arg0, %c0_i32 : i32, i32
  }
  func.func @transform_5(%arg0: i32, %arg1: i32) -> (i32, i32) {
    %c0_i32 = arith.constant 0 : i32
    %c0_i32_0 = arith.constant 0 : i32
    return %arg0, %c0_i32 : i32, i32
  }
}

</mosaic_0001>

<bundles_post_ra>
// kernel: tpu_custom_call.1
= control target key start
LH: loop header
LB: loop body
LE: loop exit
PB: predicated region body
PF: predicated region fallthrough
CT: control target
= control target key end

     0   :  { %v1048_v1 = vmov 0   ;;  %vm129_vm0 = vcmask 261120   ;;  %vm24_vm1 = vcmask 7168   ;;  %v1049_v15 = vmov -1e+30   ;;  %s1804_s1 = inlined_call_operand.vmem [shape: bf16[32,128], index: 1, kind: input, shape index: {}]   ;;  %s1805_s0 = inlined_call_operand.vmem [shape: bf16[128,32], index: 0, kind: input, shape index: {}]   ;;  %s1806_s2 = inlined_call_operand.vmem [shape: f32[128,1], index: 2, kind: input, shape index: {}]   ;;  %s1807_s4 = inlined_call_operand.vmem [shape: f32[128,1], index: 4, kind: output, shape index: {0}]   ;;  %s1808_s3 = inlined_call_operand.vmem [shape: f32[1,128], index: 3, kind: input, shape index: {}]   ;;  %s1809_s5 = inlined_call_operand.vmem [shape: f32[128,1], index: 5, kind: output, shape index: {1}]  }
   0x1   :  { %v990_v0 = vld [vmem:[%s1804_s1] sm:$0xff]   ;;  %989 = vset.pattern.permute.xlu1 %v1048_v1  ;;  %988 = vset.pattern.permute.xlu0 %v1048_v1  ;;  %v991_v2 = vld [vmem:[%s1804_s1 + $0x8] sm:$0xff]   ;;  %v253_v5 = vld [vmem:[%s1806_s2 + $0x10] sm:$0xff]  ;;  %27 = vst.msk [vmem:[%s1807_s4 + $0x10] sm:$0xff] %vm24_vm1, %v1049_v15  ;;  %v435_v18 = vlaneseq }
   0x2   :  { %961 = vmatprep.subr.bf16.mxu0 %v990_v0  ;;  %v992_v3 = vld [vmem:[%s1805_s0] sm:$0xff]   ;;  %981 = vmatprep.subr.bf16.mxu1 %v990_v0  ;;  %v993_v4 = vld [vmem:[%s1805_s0 + $0x8] sm:$0xff]   ;;  %v994_v7 = vld [vmem:[%s1805_s0 + $0x10] sm:$0xff]   ;;  %25 = vst.msk [vmem:[%s1807_s4] sm:$0xff] %vm24_vm1, %v1049_v15 }
   0x3   :  { %962 = vmatpush3.bf16.msra.mxu0 %v990_v0  ;;  %983 = vmatpush3.bf16.msra.mxu1 %v990_v0  ;;  %v251_v6 = vld [vmem:[%s1806_s2] sm:$0xff]  ;;  %v254_v8 = vld [vmem:[%s1806_s2 + $0x18] sm:$0xff]  ;;  %v252_v9 = vld [vmem:[%s1806_s2 + $0x8] sm:$0xff]  ;;  %26 = vst.msk [vmem:[%s1807_s4 + $0x8] sm:$0xff] %vm24_vm1, %v1049_v15  ;;  %v1207_v20 = vshrl.u32 %v435_v18, 7  ;;  %v1213_v24 = vand.u32 127, %v435_v18 }
   0x4   :  { %963 = vmatprep.subr.bf16.mxu0 %v991_v2  ;;  %965 = vmatprep.mubr.msk.bf16.mxu0 %vm129_vm0, %v992_v3  ;;  %v256_v10 = vld [vmem:[%s1806_s2 + $0x28] sm:$0xff]  ;;  %v255_v11 = vld [vmem:[%s1806_s2 + $0x20] sm:$0xff]  ;;  %v995_v12 = vld [vmem:[%s1805_s0 + $0x18] sm:$0xff]   ;;  %28 = vst.msk [vmem:[%s1807_s4 + $0x18] sm:$0xff] %vm24_vm1, %v1049_v15 }
   0x5   :  { %982 = vmatprep.subr.bf16.mxu1 %v991_v2  ;;  %280 = vperm.xlu1 %989, %v253_v5   ;;  %v258_v13 = vld [vmem:[%s1806_s2 + $0x38] sm:$0xff]  ;;  %v257_v14 = vld [vmem:[%s1806_s2 + $0x30] sm:$0xff]  ;;  %29 = vst.msk [vmem:[%s1807_s4 + $0x20] sm:$0xff] %vm24_vm1, %v1049_v15  ;;  %30 = vst.msk [vmem:[%s1807_s4 + $0x28] sm:$0xff] %vm24_vm1, %v1049_v15  ;;  %v438_v23 = vadd.s32 16, %v1207_v20  ;;  %v437_v35 = vadd.s32 8, %v1207_v20  ;;  %vm474_vm6 = vcmp.ne.s32.totalorder %v1207_v20, %v1213_v24 }
   0x6   :  { %270 = vperm.xlu0 %988, %v251_v6   ;;  %31 = vst.msk [vmem:[%s1807_s4 + $0x30] sm:$0xff] %vm24_vm1, %v1049_v15  ;;  %32 = vst.msk [vmem:[%s1807_s4 + $0x38] sm:$0xff] %vm24_vm1, %v1049_v15  ;;  %v950_v21 = vld [vmem:[%s1808_s3] ss:$0 sm:$0xff]  ;;  %vm522_vm3 = vcmp.lt.s32.totalorder %v1213_v24, 64  ;;  %v439_v42 = vadd.s32 24, %v1207_v20 }
   0x7   :  { %964 = vmatpush3.bf16.msra.mxu0 %v991_v2  ;;  %984 = vmatpush3.bf16.msra.mxu1 %v991_v2  ;;  %33 = vst.msk [vmem:[%s1807_s4 + $0x40] sm:$0xff] %vm24_vm1, %v1049_v15  ;;  %34 = vst.msk [vmem:[%s1807_s4 + $0x48] sm:$0xff] %vm24_vm1, %v1049_v15  ;;  %vm476_vm2 = vcmp.ne.s32.totalorder %v438_v23, %v1213_v24  ;;  %vm475_vm5 = vcmp.ne.s32.totalorder %v437_v35, %v1213_v24  ;;  %v440_v50 = vadd.s32 32, %v1207_v20 }
   0x8   :  { %35 = vst.msk [vmem:[%s1807_s4 + $0x50] sm:$0xff] %vm24_vm1, %v1049_v15  ;;  %36 = vst.msk [vmem:[%s1807_s4 + $0x58] sm:$0xff] %vm24_vm1, %v1049_v15  ;;  %vm477_vm7 = vcmp.ne.s32.totalorder %v439_v42, %v1213_v24  ;;  %v442_v55 = vadd.s32 48, %v1207_v20  ;;  %v441_v3 = vadd.s32 40, %v1207_v20 }
   0x9   :  { %285 = vperm.xlu1 %989, %v254_v8   ;;  %37 = vst.msk [vmem:[%s1807_s4 + $0x60] sm:$0xff] %vm24_vm1, %v1049_v15  ;;  %38 = vst.msk [vmem:[%s1807_s4 + $0x68] sm:$0xff] %vm24_vm1, %v1049_v15  ;;  %vm478_vm10 = vcmp.ne.s32.totalorder %v440_v50, %v1213_v24 }
   0xa   :  { %966 = vmatmul.mubr.msk.bf16.vlgmr.msra.gmra.mrb[0].mxu0 %vm129_vm0, %v993_v4  ;;  %275 = vperm.xlu0 %988, %v252_v9   ;;  %39 = vst.msk [vmem:[%s1807_s4 + $0x70] sm:$0xff] %vm24_vm1, %v1049_v15  ;;  %40 = vst.msk [vmem:[%s1807_s4 + $0x78] sm:$0xff] %vm24_vm1, %v1049_v15  ;;  %vm479_vm12 = vcmp.ne.s32.totalorder %v441_v3, %v1213_v24  ;;  %vm480_vm14 = vcmp.ne.s32.totalorder %v442_v55, %v1213_v24 }
   0xb   :  { %969 = vmatprep.mubr.msk.bf16.mxu0 %vm129_vm0, %v994_v7  ;;  %vm1221_vm4 = vmand %vm476_vm2, %vm522_vm3 }
   0xc   :  { %vm1237_vm8 = vmand %vm475_vm5, %vm522_vm3  ;;  %v1478_v55 = vld [vmem:[%s1807_s4 + $0x20] sm:$0xff] }
   0xd   :  { %295 = vperm.xlu1 %989, %v256_v10   ;;  %vm1247_vm9 = vmand %vm474_vm6, %vm522_vm3 }
   0xe   :  { %290 = vperm.xlu0 %988, %v255_v11   ;;  %vm1267_vm11 = vmand %vm477_vm7, %vm522_vm3 }
   0xf   :  { %vm1276_vm13 = vmand %vm478_vm10, %vm522_vm3 }
  0x10   :  { %vm1288_vm15 = vmand %vm479_vm12, %vm522_vm3 }
  0x11   :  { %305 = vperm.xlu1 %989, %v258_v13   ;;  %vm1300_vm2 = vmand %vm480_vm14, %vm522_vm3 }
  0x12   :  { %970 = vmatmul.mubr.msk.bf16.gmra.mrb[4].mxu0 %vm129_vm0, %v995_v12  ;;  %300 = vperm.xlu0 %988, %v257_v14  }
  0x84   :  { %v281_v17 = vpop.permute.xlu1 %280 }
  0x85   :  { %v271_v16 = vpop.permute.xlu0 %270  ;;  %v356_v25 = vadd.f32 %v950_v21, %v281_v17 }
  0x86   :  { %v354_v27 = vadd.f32 %v950_v21, %v271_v16 }
  0x88   :  { %v286_v22 = vpop.permute.xlu1 %285 }
  0x89   :  { %v276_v19 = vpop.permute.xlu0 %275  ;;  %v357_v36 = vadd.f32 %v950_v21, %v286_v22  ;;  %v443_v22 = vadd.s32 56, %v1207_v20 }
  0x8a   :  { %v355_v32 = vadd.f32 %v950_v21, %v276_v19 }
  0x8b   :  { %vm481_vm5 = vcmp.ne.s32.totalorder %v443_v22, %v1213_v24  ;;  %v996_v24 = vld [vmem:[%s1805_s0 + $0x20] sm:$0xff]  }
  0x8c   :  { %v296_v31 = vpop.permute.xlu1 %295  ;;  %vm1316_vm6 = vmand %vm481_vm5, %vm522_vm3  ;;  %973 = vmatprep.mubr.msk.bf16.mxu1 %vm129_vm0, %v996_v24 }
  0x8d   :  { %v291_v26 = vpop.permute.xlu0 %290  ;;  %v359_v8 = vadd.f32 %v950_v21, %v296_v31  ;;  %v563_v31 = vld [vmem:[%s1807_s4 + $0x40] sm:$0xff] }
  0x8e   :  { %v358_v62 = vadd.f32 %v950_v21, %v291_v26 }
  0x90   :  { %v306_v51 = vpop.permute.xlu1 %305 }
  0x91   :  { %v301_v44 = vpop.permute.xlu0 %300  ;;  %v361_v4 = vadd.f32 %v950_v21, %v306_v51 }
  0x92   :  { %v360_v52 = vadd.f32 %v950_v21, %v301_v44  ;;  %v1433_v44 = vld [vmem:[%s1807_s4 + $0x8] sm:$0xff] }
  0x93   :  { %v564_v21 = vld [vmem:[%s1807_s4 + $0x48] sm:$0xff] }
  0xdd   :  { %v967_v28 = vpop.f32.mrb[0].mxu0 }
  0xde   :  { %v372_v29 = vmul.f32 2.0, %v967_v28  ;;  %v188_v30 = vpop.f32.mrb[1].mxu0 }
  0xdf   :  { %v370_v33 = vmul.f32 2.0, %v188_v30  ;;  %v968_v34 = vpop.f32.mrb[2].mxu0 }
  0xe0   :  { %v388_v37 = vsub.f32 %v356_v25, %v372_v29  ;;  %v373_v38 = vmul.f32 2.0, %v968_v34  ;;  %v191_v39 = vpop.f32.mrb[3].mxu0 }
  0xe1   :  { %v386_v40 = vsub.f32 %v354_v27, %v370_v33  ;;  %v371_v41 = vmul.f32 2.0, %v191_v39  ;;  %v998_v39 = vld [vmem:[%s1805_s0 + $0x30] sm:$0xff]  }
  0xe2   :  { %v389_v43 = vsub.f32 %v357_v36, %v373_v38  ;;  %v404_v45 = vmax.f32 %v388_v37, 0.0  ;;  %v1050_v37 = vmov 0.0   ;;  %v997_v38 = vld [vmem:[%s1805_s0 + $0x28] sm:$0xff]   ;;  %v565_v27 = vld [vmem:[%s1807_s4 + $0x50] sm:$0xff] }
  0xe3   :  { %v387_v46 = vsub.f32 %v355_v32, %v371_v41  ;;  %v402_v48 = vmax.f32 %v386_v40, 0.0  ;;  %49 = vst.msk [vmem:[%s1809_s5 + $0x40] sm:$0xff] %vm24_vm1, %v1050_v37  ;;  %41 = vst.msk [vmem:[%s1809_s5] sm:$0xff] %vm24_vm1, %v1050_v37  ;;  %974 = vmatmul.mubr.msk.bf16.vlgmr.msra.gmra.mrb[0].mxu1 %vm129_vm0, %v997_v38  ;;  %v999_v40 = vld [vmem:[%s1805_s0 + $0x38] sm:$0xff]   ;;  %v1425_v41 = vld [vmem:[%s1807_s4 + $0x10] sm:$0xff] }
  0xe4   :  { %v420_v49 = vmul.f32 -0.5, %v404_v45  ;;  %v405_v61 = vmax.f32 %v389_v43, 0.0  ;;  %42 = vst.msk [vmem:[%s1809_s5 + $0x8] sm:$0xff] %vm24_vm1, %v1050_v37  ;;  %43 = vst.msk [vmem:[%s1809_s5 + $0x10] sm:$0xff] %vm24_vm1, %v1050_v37  ;;  %977 = vmatprep.mubr.msk.bf16.mxu1 %vm129_vm0, %v998_v39  ;;  %v1438_v45 = vld [vmem:[%s1807_s4] sm:$0xff] }
  0xe5   :  { %v971_v53 = vpop.f32.mrb[4].mxu0  ;;  %v403_v54 = vmax.f32 %v387_v46, 0.0  ;;  %v418_v60 = vmul.f32 -0.5, %v402_v48  ;;  %44 = vst.msk [vmem:[%s1809_s5 + $0x18] sm:$0xff] %vm24_vm1, %v1050_v37  ;;  %45 = vst.msk [vmem:[%s1809_s5 + $0x20] sm:$0xff] %vm24_vm1, %v1050_v37 }
  0xe6   :  { %v376_v56 = vmul.f32 2.0, %v971_v53  ;;  %v204_v57 = vpop.f32.mrb[5].mxu0  ;;  %v1233_v58 = vsel %vm1221_vm4, %v420_v49, -1e+30  ;;  %v421_v14 = vmul.f32 -0.5, %v405_v61  ;;  %46 = vst.msk [vmem:[%s1809_s5 + $0x28] sm:$0xff] %vm24_vm1, %v1050_v37 }
  0xe7   :  { %v374_v63 = vmul.f32 2.0, %v204_v57  ;;  %575 = vmax.xlane.f32.xlu0 %v1233_v58  ;;  %v972_v0 = vpop.f32.mrb[6].mxu0  ;;  %v419_v1 = vmul.f32 -0.5, %v403_v54  ;;  %v1260_v13 = vsel %vm1247_vm9, %v418_v60, -1e+30  ;;  %47 = vst.msk [vmem:[%s1809_s5 + $0x30] sm:$0xff] %vm24_vm1, %v1050_v37 }
  0xe8   :  { %v392_v5 = vsub.f32 %v360_v52, %v376_v56  ;;  %v377_v6 = vmul.f32 2.0, %v972_v0  ;;  %v207_v7 = vpop.f32.mrb[7].mxu0  ;;  %v1284_v26 = vsel %vm1267_vm11, %v421_v14, -1e+30  ;;  %48 = vst.msk [vmem:[%s1809_s5 + $0x38] sm:$0xff] %vm24_vm1, %v1050_v37  ;;  %50 = vst.msk [vmem:[%s1809_s5 + $0x48] sm:$0xff] %vm24_vm1, %v1050_v37 }
  0xe9   :  { %v390_v9 = vsub.f32 %v358_v62, %v374_v63  ;;  %v375_v10 = vmul.f32 2.0, %v207_v7  ;;  %v1255_v11 = vsel %vm1237_vm8, %v419_v1, -1e+30  ;;  %51 = vst.msk [vmem:[%s1809_s5 + $0x50] sm:$0xff] %vm24_vm1, %v1050_v37  ;;  %52 = vst.msk [vmem:[%s1809_s5 + $0x58] sm:$0xff] %vm24_vm1, %v1050_v37  ;;  %v1465_v53 = vld [vmem:[%s1807_s4 + $0x18] sm:$0xff] }
  0xea   :  { %v393_v12 = vsub.f32 %v361_v4, %v377_v6  ;;  %573 = vmax.xlane.f32.xlu1 %v1255_v11  ;;  %v408_v19 = vmax.f32 %v392_v5, 0.0  ;;  %53 = vst.msk [vmem:[%s1809_s5 + $0x60] sm:$0xff] %vm24_vm1, %v1050_v37  ;;  %54 = vst.msk [vmem:[%s1809_s5 + $0x68] sm:$0xff] %vm24_vm1, %v1050_v37  ;;  %v1489_v62 = vld [vmem:[%s1807_s4 + $0x28] sm:$0xff]  ;;  %v1502_v0 = vld [vmem:[%s1807_s4 + $0x30] sm:$0xff] }
  0xeb   :  { %v391_v16 = vsub.f32 %v359_v8, %v375_v10  ;;  %571 = vmax.xlane.f32.xlu0 %v1260_v13  ;;  %v406_v18 = vmax.f32 %v390_v9, 0.0  ;;  %55 = vst.msk [vmem:[%s1809_s5 + $0x70] sm:$0xff] %vm24_vm1, %v1050_v37  ;;  %56 = vst.msk [vmem:[%s1809_s5 + $0x78] sm:$0xff] %vm24_vm1, %v1050_v37  ;;  %978 = vmatmul.mubr.msk.bf16.gmra.mrb[4].mxu1 %vm129_vm0, %v999_v40  ;;  %v1520_v7 = vld [vmem:[%s1807_s4 + $0x38] sm:$0xff] }
  0xec   :  { %v409_v28 = vmax.f32 %v393_v12, 0.0  ;;  %v424_v30 = vmul.f32 -0.5, %v408_v19 }
  0xed   :  { %v407_v23 = vmax.f32 %v391_v16, 0.0  ;;  %v422_v25 = vmul.f32 -0.5, %v406_v18 }
  0xee   :  { %v425_v33 = vmul.f32 -0.5, %v409_v28  ;;  %v1312_v34 = vsel %vm1300_vm2, %v424_v30, -1e+30 }
  0xef   :  { %577 = vmax.xlane.f32.xlu0 %v1284_v26  ;;  %v1295_v20 = vsel %vm1276_vm13, %v422_v25, -1e+30  ;;  %v423_v29 = vmul.f32 -0.5, %v407_v23 }
  0xf0   :  { %579 = vmax.xlane.f32.xlu1 %v1295_v20  ;;  %v1323_v36 = vsel %vm1316_vm6, %v425_v33, -1e+30 }
  0xf1   :  { %v1307_v32 = vsel %vm1288_vm15, %v423_v29, -1e+30 }
  0xf3   :  { %581 = vmax.xlane.f32.xlu0 %v1307_v32 }
  0xf4   :  { %583 = vmax.xlane.f32.xlu1 %v1312_v34 }
  0xf7   :  { %585 = vmax.xlane.f32.xlu0 %v1323_v36 }
 0x174   :  { %v576_v42 = vpop.xlane.xlu0 %575 }
 0x175   :  { %v1428_v43 = vmax.f32 %v1425_v41, %v576_v42 }
 0x177   :  { %v765_v46 = vsub.f32 %v1425_v41, %v1428_v43  ;;  %910 = vst.msk [vmem:[%s1807_s4 + $0x10] sm:$0xff] %vm24_vm1, %v1428_v43  ;;  %v574_v48 = vpop.xlane.xlu1 %573  ;;  %631 = vperm.xlu1 %989, %v1428_v43  }
 0x178   :  { %v1449_v49 = vmax.f32 %v1433_v44, %v574_v48  ;;  %v572_v50 = vpop.xlane.xlu0 %571 }
 0x179   :  { %v1452_v51 = vmax.f32 %v1438_v45, %v572_v50 }
 0x17a   :  { %v764_v52 = vsub.f32 %v1433_v44, %v1449_v49  ;;  %909 = vst.msk [vmem:[%s1807_s4 + $0x8] sm:$0xff] %vm24_vm1, %v1449_v49  ;;  %626 = vperm.xlu0 %988, %v1449_v49  }
 0x17b   :  { %v763_v54 = vsub.f32 %v1438_v45, %v1452_v51  ;;  %908 = vst.msk [vmem:[%s1807_s4] sm:$0xff] %vm24_vm1, %v1452_v51  ;;  %621 = vperm.xlu1 %989, %v1452_v51   ;;  %v813_v45 = vld [vmem:[%s1809_s5 + $0x10] sm:$0xff] }
 0x17c   :  { %v578_v56 = vpop.xlane.xlu0 %577 }
 0x17d   :  { %v1481_v57 = vmax.f32 %v1465_v53, %v578_v56  ;;  %v580_v60 = vpop.xlane.xlu1 %579 }
 0x17e   :  { %v1484_v61 = vmax.f32 %v1478_v55, %v580_v60 }
 0x17f   :  { %v766_v63 = vsub.f32 %v1465_v53, %v1481_v57  ;;  %911 = vst.msk [vmem:[%s1807_s4 + $0x18] sm:$0xff] %vm24_vm1, %v1481_v57  ;;  %636 = vperm.xlu1 %989, %v1481_v57   ;;  %v811_v53 = vld [vmem:[%s1809_s5] sm:$0xff] }
 0x180   :  { %v767_v1 = vsub.f32 %v1478_v55, %v1484_v61  ;;  %912 = vst.msk [vmem:[%s1807_s4 + $0x20] sm:$0xff] %vm24_vm1, %v1484_v61  ;;  %v582_v3 = vpop.xlane.xlu0 %581 }
 0x181   :  { %v1512_v4 = vmax.f32 %v1489_v62, %v582_v3  ;;  %v584_v5 = vpop.xlane.xlu1 %583 }
 0x182   :  { %v1515_v6 = vmax.f32 %v1502_v0, %v584_v5  ;;  %v787_v44 = vmul.f32 1.442695, %v767_v1  ;;  %v814_v1 = vld [vmem:[%s1809_s5 + $0x18] sm:$0xff] }
 0x183   :  { %v768_v8 = vsub.f32 %v1489_v62, %v1512_v4  ;;  %913 = vst.msk [vmem:[%s1807_s4 + $0x28] sm:$0xff] %vm24_vm1, %v1512_v4  ;;  %646 = vperm.xlu1 %989, %v1512_v4  }
 0x184   :  { %v769_v9 = vsub.f32 %v1502_v0, %v1515_v6  ;;  %914 = vst.msk [vmem:[%s1807_s4 + $0x30] sm:$0xff] %vm24_vm1, %v1515_v6  ;;  %651 = vperm.xlu0 %988, %v1515_v6   ;;  %v586_v10 = vpop.xlane.xlu0 %585 }
 0x185   :  { %v1539_v12 = vmax.f32 %v1520_v7, %v586_v10  ;;  %v789_v57 = vmul.f32 1.442695, %v768_v8 }
 0x186   :  { %v791_v41 = vmul.f32 1.442695, %v769_v9  ;;  %v812_v9 = vld [vmem:[%s1809_s5 + $0x8] sm:$0xff] }
 0x187   :  { %v770_v14 = vsub.f32 %v1520_v7, %v1539_v12  ;;  %915 = vst.msk [vmem:[%s1807_s4 + $0x38] sm:$0xff] %vm24_vm1, %v1539_v12  ;;  %656 = vperm.xlu1 %989, %v1539_v12  }
 0x188   :  { %641 = vperm.xlu0 %988, %v1484_v61  }
 0x1a7   :  { %587 = vmax.xlane.f32.xlu0 %v1049_v15 }
 0x1ab   :  { %589 = vmax.xlane.f32.xlu1 %v1049_v15  ;;  %591 = vmax.xlane.f32.xlu0 %v1049_v15 }
 0x1af   :  { %595 = vmax.xlane.f32.xlu1 %v1049_v15  ;;  %593 = vmax.xlane.f32.xlu0 %v1049_v15 }
 0x1b3   :  { %599 = vmax.xlane.f32.xlu1 %v1049_v15  ;;  %597 = vmax.xlane.f32.xlu0 %v1049_v15 }
 0x1b6   :  { %v975_v16 = vpop.f32.mrb[0].mxu1 }
 0x1b7   :  { %859 = vadd.xlane.f32.xlu1 %v1050_v37  ;;  %601 = vmax.xlane.f32.xlu0 %v1049_v15  ;;  %v220_v18 = vpop.f32.mrb[1].mxu1 }
 0x1b8   :  { %v976_v19 = vpop.f32.mrb[2].mxu1 }
 0x1b9   :  { %v223_v22 = vpop.f32.mrb[3].mxu1 }
 0x1bb   :  { %863 = vadd.xlane.f32.xlu1 %v1050_v37  ;;  %861 = vadd.xlane.f32.xlu0 %v1050_v37 }
 0x1be   :  { %v979_v23 = vpop.f32.mrb[4].mxu1 }
 0x1bf   :  { %867 = vadd.xlane.f32.xlu1 %v1050_v37  ;;  %865 = vadd.xlane.f32.xlu0 %v1050_v37  ;;  %v236_v25 = vpop.f32.mrb[5].mxu1 }
 0x1c0   :  { %v980_v28 = vpop.f32.mrb[6].mxu1 }
 0x1c1   :  { %v239_v29 = vpop.f32.mrb[7].mxu1 }
 0x1c3   :  { %869 = vadd.xlane.f32.xlu0 %v1050_v37 }
 0x1f6   :  { %v632_v30 = vpop.permute.xlu1 %631 }
 0x1f7   :  { %v701_v15 = vsub.f32 %v1233_v58, %v632_v30 }
 0x1f9   :  { %v719_v33 = vmul.f32 1.442695, %v701_v15  ;;  %v627_v24 = vpop.permute.xlu0 %626 }
 0x1fa   :  { %v622_v38 = vpop.permute.xlu1 %621  ;;  %v700_v40 = vsub.f32 %v1255_v11, %v627_v24 }
 0x1fb   :  { %1000 = vpow2.f32 %v719_v33  ;;  %v699_v39 = vsub.f32 %v1260_v13, %v622_v38 }
 0x1fc   :  { %v717_v56 = vmul.f32 1.442695, %v700_v40 }
 0x1fd   :  { %v715_v42 = vmul.f32 1.442695, %v699_v39 }
 0x1fe   :  { %v637_v48 = vpop.permute.xlu1 %636 }
 0x1ff   :  { %1002 = vpow2.f32 %v715_v42  ;;  %v702_v50 = vsub.f32 %v1284_v26, %v637_v48 }
 0x201   :  { %v721_v60 = vmul.f32 1.442695, %v702_v50 }
 0x202   :  { %v647_v3 = vpop.permute.xlu1 %646 }
 0x203   :  { %1004 = vpow2.f32 %v721_v60  ;;  %v652_v5 = vpop.permute.xlu0 %651  ;;  %v704_v16 = vsub.f32 %v1307_v32, %v647_v3  ;;  %v567_v60 = vld [vmem:[%s1807_s4 + $0x60] sm:$0xff]  ;;  %v566_v3 = vld [vmem:[%s1807_s4 + $0x58] sm:$0xff] }
 0x204   :  { %v705_v58 = vsub.f32 %v1312_v34, %v652_v5  ;;  %1006 = vpow2.f32 %v717_v56 }
 0x205   :  { %v1001_v10 = vpop.eup %1000  ;;  %v725_v25 = vmul.f32 1.442695, %v704_v16 }
 0x206   :  { %v727_v18 = vmul.f32 1.442695, %v705_v58  ;;  %v657_v13 = vpop.permute.xlu1 %656  ;;  %v749_v11 = vsel %vm1221_vm4, %v1001_v10, 0.0 }
 0x207   :  { %v706_v19 = vsub.f32 %v1323_v36, %v657_v13  ;;  %847 = vadd.xlane.f32.xlu1 %v749_v11  ;;  %v642_v26 = vpop.permute.xlu0 %641 }
 0x208   :  { %1008 = vpow2.f32 %v727_v18  ;;  %v703_v22 = vsub.f32 %v1295_v20, %v642_v26  ;;  %v1620_v26 = vld [vmem:[%s1807_s4 + $0x70] sm:$0xff] }
 0x209   :  { %v1003_v23 = vpop.eup %1002  ;;  %v729_v28 = vmul.f32 1.442695, %v706_v19 }
 0x20a   :  { %v723_v34 = vmul.f32 1.442695, %v703_v22  ;;  %v747_v29 = vsel %vm1247_vm9, %v1003_v23, 0.0  ;;  %v568_v22 = vld [vmem:[%s1807_s4 + $0x68] sm:$0xff] }
 0x20b   :  { %1010 = vpow2.f32 %v729_v28  ;;  %843 = vadd.xlane.f32.xlu1 %v747_v29 }
 0x20c   :  { %1012 = vpow2.f32 %v723_v34 }
 0x20d   :  { %v1005_v32 = vpop.eup %1004  ;;  %1014 = vpow2.f32 %v725_v25 }
 0x20e   :  { %v750_v47 = vsel %vm1267_vm11, %v1005_v32, 0.0  ;;  %v1007_v36 = vpop.eup %1006 }
 0x20f   :  { %849 = vadd.xlane.f32.xlu0 %v750_v47  ;;  %v748_v20 = vsel %vm1237_vm8, %v1007_v36, 0.0 }
 0x212   :  { %v1009_v30 = vpop.eup %1008 }
 0x213   :  { %845 = vadd.xlane.f32.xlu0 %v748_v20  ;;  %v753_v15 = vsel %vm1300_vm2, %v1009_v30, 0.0  ;;  %v1639_v30 = vld [vmem:[%s1807_s4 + $0x78] sm:$0xff] }
 0x214   :  { %855 = vadd.xlane.f32.xlu1 %v753_v15 }
 0x215   :  { %v1011_v2 = vpop.eup %1010 }
 0x216   :  { %v1013_v33 = vpop.eup %1012  ;;  %v754_v24 = vsel %vm1316_vm6, %v1011_v2, 0.0  ;;  %v819_v2 = vld [vmem:[%s1809_s5 + $0x40] sm:$0xff] }
 0x217   :  { %v1015_v38 = vpop.eup %1014  ;;  %857 = vadd.xlane.f32.xlu0 %v754_v24  ;;  %v751_v17 = vsel %vm1276_vm13, %v1013_v33, 0.0 }
 0x218   :  { %851 = vadd.xlane.f32.xlu1 %v751_v17  ;;  %v752_v59 = vsel %vm1288_vm15, %v1015_v38, 0.0 }
 0x21b   :  { %853 = vadd.xlane.f32.xlu0 %v752_v59 }
 0x21c   :  { %871 = vadd.xlane.f32.xlu1 %v1050_v37 }
 0x21f   :  { %873 = vadd.xlane.f32.xlu0 %v1050_v37 }
 0x234   :  { %v588_v35 = vpop.xlane.xlu0 %587 }
 0x235   :  { %v611_v39 = vmax.f32 %v563_v31, %v588_v35 }
 0x237   :  { %v771_v40 = vsub.f32 %v563_v31, %v611_v39  ;;  %916 = vst.msk [vmem:[%s1807_s4 + $0x40] sm:$0xff] %vm24_vm1, %v611_v39  ;;  %v820_v39 = vld [vmem:[%s1809_s5 + $0x48] sm:$0xff] }
 0x238   :  { %v590_v37 = vpop.xlane.xlu1 %589  ;;  %v592_v42 = vpop.xlane.xlu0 %591 }
 0x239   :  { %v795_v48 = vmul.f32 1.442695, %v771_v40  ;;  %v612_v50 = vmax.f32 %v564_v21, %v590_v37  ;;  %v613_v56 = vmax.f32 %v565_v27, %v592_v42 }
 0x23b   :  { %1016 = vpow2.f32 %v795_v48  ;;  %v772_v5 = vsub.f32 %v564_v21, %v612_v50  ;;  %917 = vst.msk [vmem:[%s1807_s4 + $0x48] sm:$0xff] %vm24_vm1, %v612_v50  ;;  %v773_v58 = vsub.f32 %v565_v27, %v613_v56  ;;  %918 = vst.msk [vmem:[%s1807_s4 + $0x50] sm:$0xff] %vm24_vm1, %v613_v56  ;;  %v821_v27 = vld [vmem:[%s1809_s5 + $0x50] sm:$0xff] }
 0x23c   :  { %v596_v10 = vpop.xlane.xlu1 %595  ;;  %v594_v16 = vpop.xlane.xlu0 %593 }
 0x23d   :  { %v797_v18 = vmul.f32 1.442695, %v772_v5  ;;  %v799_v13 = vmul.f32 1.442695, %v773_v58  ;;  %v615_v11 = vmax.f32 %v567_v60, %v596_v10  ;;  %v614_v19 = vmax.f32 %v566_v3, %v594_v16  ;;  %v822_v5 = vld [vmem:[%s1809_s5 + $0x58] sm:$0xff] }
 0x23f   :  { %1018 = vpow2.f32 %v797_v18  ;;  %v775_v23 = vsub.f32 %v567_v60, %v615_v11  ;;  %920 = vst.msk [vmem:[%s1807_s4 + $0x60] sm:$0xff] %vm24_vm1, %v615_v11  ;;  %v774_v25 = vsub.f32 %v566_v3, %v614_v19  ;;  %919 = vst.msk [vmem:[%s1807_s4 + $0x58] sm:$0xff] %vm24_vm1, %v614_v19  ;;  %v823_v60 = vld [vmem:[%s1809_s5 + $0x60] sm:$0xff] }
 0x240   :  { %1020 = vpow2.f32 %v799_v13  ;;  %v600_v28 = vpop.xlane.xlu1 %599  ;;  %v598_v34 = vpop.xlane.xlu0 %597 }
 0x241   :  { %v803_v29 = vmul.f32 1.442695, %v775_v23  ;;  %v801_v32 = vmul.f32 1.442695, %v774_v25  ;;  %v1634_v47 = vmax.f32 %v1620_v26, %v600_v28  ;;  %v616_v36 = vmax.f32 %v568_v22, %v598_v34  ;;  %v824_v23 = vld [vmem:[%s1809_s5 + $0x68] sm:$0xff] }
 0x243   :  { %1022 = vpow2.f32 %v803_v29  ;;  %v777_v20 = vsub.f32 %v1620_v26, %v1634_v47  ;;  %922 = vst.msk [vmem:[%s1807_s4 + $0x70] sm:$0xff] %vm24_vm1, %v1634_v47  ;;  %v776_v15 = vsub.f32 %v568_v22, %v616_v36  ;;  %921 = vst.msk [vmem:[%s1807_s4 + $0x68] sm:$0xff] %vm24_vm1, %v616_v36  ;;  %v783_v36 = vmul.f32 1.442695, %v765_v46  ;;  %v817_v26 = vld [vmem:[%s1809_s5 + $0x30] sm:$0xff] }
 0x244   :  { %1024 = vpow2.f32 %v801_v32  ;;  %v860_v33 = vpop.xlane.xlu1 %859  ;;  %v602_v24 = vpop.xlane.xlu0 %601  ;;  %v793_v46 = vmul.f32 1.442695, %v770_v14 }
 0x245   :  { %v1017_v38 = vpop.eup %1016  ;;  %v805_v17 = vmul.f32 1.442695, %v776_v15  ;;  %v1656_v59 = vmax.f32 %v1639_v30, %v602_v24  ;;  %v779_v15 = vmul.f32 1.442695, %v763_v54  ;;  %v807_v55 = vmul.f32 1.442695, %v777_v20 }
 0x246   :  { %v835_v31 = vmul.f32 %v1017_v38, %v819_v2  ;;  %v785_v2 = vmul.f32 1.442695, %v766_v63  ;;  %v818_v38 = vld [vmem:[%s1809_s5 + $0x38] sm:$0xff] }
 0x247   :  { %v778_v35 = vsub.f32 %v1639_v30, %v1656_v59  ;;  %923 = vst.msk [vmem:[%s1807_s4 + $0x78] sm:$0xff] %vm24_vm1, %v1656_v59  ;;  %1026 = vpow2.f32 %v805_v17 }
 0x248   :  { %v883_v21 = vadd.f32 %v860_v33, %v835_v31  ;;  %v862_v40 = vpop.xlane.xlu0 %861  ;;  %v864_v42 = vpop.xlane.xlu1 %863  ;;  %1028 = vpow2.f32 %v783_v36  ;;  %v781_v33 = vmul.f32 1.442695, %v764_v52 }
 0x249   :  { %v1019_v37 = vpop.eup %1018  ;;  %1030 = vpow2.f32 %v779_v15  ;;  %v809_v4 = vmul.f32 1.442695, %v778_v35  ;;  %v815_v35 = vld [vmem:[%s1809_s5 + $0x20] sm:$0xff] }
 0x24a   :  { %v1021_v48 = vpop.eup %1020  ;;  %900 = vst.msk [vmem:[%s1809_s5 + $0x40] sm:$0xff] %vm24_vm1, %v883_v21  ;;  %v836_v50 = vmul.f32 %v1019_v37, %v820_v39  ;;  %1032 = vpow2.f32 %v785_v2 }
 0x24b   :  { %v837_v56 = vmul.f32 %v1021_v48, %v821_v27  ;;  %1034 = vpow2.f32 %v781_v33 }
 0x24c   :  { %v884_v3 = vadd.f32 %v862_v40, %v836_v50  ;;  %v866_v58 = vpop.xlane.xlu0 %865  ;;  %v868_v11 = vpop.xlane.xlu1 %867  ;;  %1036 = vpow2.f32 %v791_v41 }
 0x24d   :  { %v1023_v10 = vpop.eup %1022  ;;  %v885_v16 = vadd.f32 %v864_v42, %v837_v56  ;;  %1038 = vpow2.f32 %v793_v46  ;;  %v816_v42 = vld [vmem:[%s1809_s5 + $0x28] sm:$0xff] }
 0x24e   :  { %v1025_v18 = vpop.eup %1024  ;;  %v839_v13 = vmul.f32 %v1023_v10, %v823_v60  ;;  %901 = vst.msk [vmem:[%s1809_s5 + $0x48] sm:$0xff] %vm24_vm1, %v884_v3  ;;  %1040 = vpow2.f32 %v787_v44  ;;  %v825_v60 = vld [vmem:[%s1809_s5 + $0x70] sm:$0xff] }
 0x24f   :  { %902 = vst.msk [vmem:[%s1809_s5 + $0x50] sm:$0xff] %vm24_vm1, %v885_v16  ;;  %v838_v19 = vmul.f32 %v1025_v18, %v822_v5  ;;  %1042 = vpow2.f32 %v789_v57  ;;  %v826_v18 = vld [vmem:[%s1809_s5 + $0x78] sm:$0xff] }
 0x250   :  { %v887_v22 = vadd.f32 %v868_v11, %v839_v13  ;;  %v870_v34 = vpop.xlane.xlu0 %869  ;;  %1044 = vpow2.f32 %v807_v55 }
 0x251   :  { %v886_v25 = vadd.f32 %v866_v58, %v838_v19  ;;  %v1027_v28 = vpop.eup %1026  ;;  %1046 = vpow2.f32 %v809_v4 }
 0x252   :  { %904 = vst.msk [vmem:[%s1809_s5 + $0x60] sm:$0xff] %vm24_vm1, %v887_v22  ;;  %v840_v29 = vmul.f32 %v1027_v28, %v824_v23  ;;  %v1029_v43 = vpop.eup %1028 }
 0x253   :  { %903 = vst.msk [vmem:[%s1809_s5 + $0x58] sm:$0xff] %vm24_vm1, %v886_v25  ;;  %v829_v49 = vmul.f32 %v1029_v43, %v813_v45  ;;  %v1031_v51 = vpop.eup %1030 }
 0x254   :  { %v888_v32 = vadd.f32 %v870_v34, %v840_v29  ;;  %v827_v61 = vmul.f32 %v1031_v51, %v811_v53  ;;  %v1033_v63 = vpop.eup %1032 }
 0x255   :  { %v830_v6 = vmul.f32 %v1033_v63, %v814_v1  ;;  %v1035_v7 = vpop.eup %1034 }
 0x256   :  { %905 = vst.msk [vmem:[%s1809_s5 + $0x68] sm:$0xff] %vm24_vm1, %v888_v32  ;;  %v1037_v12 = vpop.eup %1036  ;;  %v828_v47 = vmul.f32 %v1035_v7, %v812_v9 }
 0x257   :  { %v1039_v30 = vpop.eup %1038  ;;  %v833_v24 = vmul.f32 %v1037_v12, %v817_v26 }
 0x258   :  { %v1041_v17 = vpop.eup %1040  ;;  %v834_v21 = vmul.f32 %v1039_v30, %v818_v38 }
 0x259   :  { %v1043_v27 = vpop.eup %1042  ;;  %v831_v37 = vmul.f32 %v1041_v17, %v815_v35 }
 0x25a   :  { %v1045_v48 = vpop.eup %1044  ;;  %v832_v5 = vmul.f32 %v1043_v27, %v816_v42 }
 0x25b   :  { %v1047_v58 = vpop.eup %1046  ;;  %v841_v16 = vmul.f32 %v1045_v48, %v825_v60 }
 0x25c   :  { %v842_v22 = vmul.f32 %v1047_v58, %v826_v18 }
 0x294   :  { %v848_v52 = vpop.xlane.xlu1 %847 }
 0x295   :  { %v877_v54 = vadd.f32 %v848_v52, %v829_v49 }
 0x297   :  { %894 = vst.msk [vmem:[%s1809_s5 + $0x10] sm:$0xff] %vm24_vm1, %v877_v54 }
 0x298   :  { %v844_v0 = vpop.xlane.xlu1 %843 }
 0x299   :  { %v875_v62 = vadd.f32 %v844_v0, %v827_v61 }
 0x29b   :  { %892 = vst.msk [vmem:[%s1809_s5] sm:$0xff] %vm24_vm1, %v875_v62 }
 0x29c   :  { %v850_v8 = vpop.xlane.xlu0 %849 }
 0x29d   :  { %v878_v14 = vadd.f32 %v850_v8, %v830_v6 }
 0x29f   :  { %895 = vst.msk [vmem:[%s1809_s5 + $0x18] sm:$0xff] %vm24_vm1, %v878_v14 }
 0x2a0   :  { %v846_v20 = vpop.xlane.xlu0 %845 }
 0x2a1   :  { %v876_v59 = vadd.f32 %v846_v20, %v828_v47  ;;  %v856_v31 = vpop.xlane.xlu1 %855 }
 0x2a2   :  { %v881_v39 = vadd.f32 %v856_v31, %v833_v24 }
 0x2a3   :  { %893 = vst.msk [vmem:[%s1809_s5 + $0x8] sm:$0xff] %vm24_vm1, %v876_v59 }
 0x2a4   :  { %898 = vst.msk [vmem:[%s1809_s5 + $0x30] sm:$0xff] %vm24_vm1, %v881_v39  ;;  %v858_v40 = vpop.xlane.xlu0 %857 }
 0x2a5   :  { %v882_v50 = vadd.f32 %v858_v40, %v834_v21  ;;  %v852_v56 = vpop.xlane.xlu1 %851 }
 0x2a6   :  { %v879_v3 = vadd.f32 %v852_v56, %v831_v37 }
 0x2a7   :  { %899 = vst.msk [vmem:[%s1809_s5 + $0x38] sm:$0xff] %vm24_vm1, %v882_v50 }
 0x2a8   :  { %896 = vst.msk [vmem:[%s1809_s5 + $0x20] sm:$0xff] %vm24_vm1, %v879_v3  ;;  %v854_v10 = vpop.xlane.xlu0 %853 }
 0x2a9   :  { %v880_v13 = vadd.f32 %v854_v10, %v832_v5  ;;  %v872_v11 = vpop.xlane.xlu1 %871 }
 0x2aa   :  { %v889_v19 = vadd.f32 %v872_v11, %v841_v16 }
 0x2ab   :  { %897 = vst.msk [vmem:[%s1809_s5 + $0x28] sm:$0xff] %vm24_vm1, %v880_v13 }
 0x2ac   :  { %906 = vst.msk [vmem:[%s1809_s5 + $0x70] sm:$0xff] %vm24_vm1, %v889_v19  ;;  %v874_v23 = vpop.xlane.xlu0 %873 }
 0x2ad   :  { %v890_v25 = vadd.f32 %v874_v23, %v842_v22 }
 0x2af   :  { %907 = vst.msk [vmem:[%s1809_s5 + $0x78] sm:$0xff] %vm24_vm1, %v890_v25 }

</bundles_post_ra>
